<compile_context>
chip_gen: v5e
topology: v5e:2x2
jax: 0.10.0
libtpu: 0.0.40
codegen_flags: <defaults>
</compile_context>

<pallas_src>
import functools

import jax
import jax.numpy as jnp
from jax.experimental import pallas as pl
from jax.experimental.pallas import tpu as pltpu


def _lstm_fc_kernel(x_ref, w_ref, out_ref, *, seq_len, batch_pad, hidden_size,
                    in_pad, head_lanes):
    """Whole LSTM + final FC in one invocation.

    x_ref   : (T*Bp, Ip)   time-major, batch padded to Bp=8, feature padded to
                           Ip=16 with a constant-1 bias column at index I.
    w_ref   : (Ip + H + H + Bp, 4H) packed parameters:
                rows [0:Ip)        W_ih^T (g cols pre-scaled by 2) + bias row
                rows [Ip:Ip+H)     W_hh^T (g cols pre-scaled by 2)
                rows [Ip+H:Ip+2H)  W_fc^T zero-padded to 4H lanes
                rows [Ip+2H:+Bp)   b_fc replicated over Bp rows, padded lanes
    out_ref : (Bp, head_lanes)  lane-dense; real logits live in [:, :2].
    """
    T, B, H = seq_len, batch_pad, hidden_size
    r1 = in_pad          # end of W_ih block
    r2 = r1 + H          # end of W_hh block
    r3 = r2 + H          # end of W_fc block
    r4 = r3 + B          # end of b_fc block

    w_ih = w_ref[0:r1, :]        # (Ip, 4H) — includes the folded gate bias row
    w_hh = w_ref[r1:r2, :]       # (H, 4H)

    # Input projection (+ gate bias via the constant-1 column) for ALL
    # timesteps in a single prologue MXU matmul, off the serial chain.
    xg = jnp.dot(x_ref[...], w_ih, preferred_element_type=jnp.float32)
    xg = xg.reshape(T, B, 4 * H)          # leading-axis split only: free

    h = jnp.zeros((B, H), jnp.float32)
    c = jnp.zeros((B, H), jnp.float32)

    # Fully unrolled recurrence (T small, static). Per step: one (8,H)x(H,4H)
    # matmul, one full-width sigmoid and one tanh on the dependency chain.
    for t in range(T):
        gates = xg[t] + jnp.dot(h, w_hh, preferred_element_type=jnp.float32)
        sg = jax.nn.sigmoid(gates)             # one EUP pass over all 4 gates
        i_g = sg[:, 0 * H:1 * H]
        f_g = sg[:, 1 * H:2 * H]
        g_g = 2.0 * sg[:, 2 * H:3 * H] - 1.0   # == tanh(g); g cols pre-scaled x2
        o_g = sg[:, 3 * H:4 * H]
        c = f_g * c + i_g * g_g
        h = o_g * jnp.tanh(c)

    # FC head on the last hidden state, lane-dense (Bp, 128) store.
    w_fc = w_ref[r2:r3, :head_lanes]           # (H, 128)
    b_fc = w_ref[r3:r4, :head_lanes]           # (Bp, 128), bias replicated
    out_ref[...] = (jnp.dot(h, w_fc, preferred_element_type=jnp.float32)
                    + b_fc)


def rnn_fall_detector_forward(x, params):
    """x: (batch, seq, input_size) float32 — PyTorch batch_first convention."""
    B, T, I = x.shape
    H = params["w_hh"].shape[0]          # w_hh stored as (H, 4H)
    four_h = 4 * H

    B_pad = max(8, ((B + 7) // 8) * 8)           # sublane-aligned batch
    I_pad = ((I + 1 + 7) // 8) * 8               # +1 bias column, 8-aligned
    HEAD_LANES = 128                             # lane-dense head output

    # --- pack inputs ---------------------------------------------------------
    # Time-major, batch/feature padded, constant-1 bias column at index I.
    x_pad = jnp.zeros((T, B_pad, I_pad), jnp.float32)
    x_pad = x_pad.at[:, :B, :I].set(jnp.transpose(x, (1, 0, 2)))
    x_pad = x_pad.at[:, :, I].set(1.0)
    x_flat = x_pad.reshape(T * B_pad, I_pad)

    # Pre-scale the g-gate (cell-candidate) columns by 2 so the kernel can use
    # the exact identity tanh(g) = 2*sigmoid(2g) - 1 with one full-width sigmoid.
    def scale_g(w):
        return w.at[..., 2 * H:3 * H].multiply(2.0)

    w_ih_s = scale_g(params["w_ih"])                          # (I, 4H)
    w_hh_s = scale_g(params["w_hh"])                          # (H, 4H)
    b_s = scale_g(params["b_ih"] + params["b_hh"])            # (4H,)

    # One packed parameter array -> a single HBM->VMEM DMA.
    w_ih_blk = jnp.zeros((I_pad, four_h), jnp.float32)
    w_ih_blk = w_ih_blk.at[:I, :].set(w_ih_s)
    w_ih_blk = w_ih_blk.at[I, :].set(b_s)                     # folded gate bias

    w_fc_blk = jnp.zeros((H, four_h), jnp.float32)
    w_fc_blk = w_fc_blk.at[:, :2].set(params["w_fc"])

    b_fc_blk = jnp.zeros((B_pad, four_h), jnp.float32)
    b_fc_blk = b_fc_blk.at[:, :2].set(
        jnp.broadcast_to(params["b_fc"].reshape(1, 2), (B_pad, 2)))

    packed = jnp.concatenate([w_ih_blk, w_hh_s, w_fc_blk, b_fc_blk], axis=0)

    kernel = functools.partial(
        _lstm_fc_kernel, seq_len=T, batch_pad=B_pad, hidden_size=H,
        in_pad=I_pad, head_lanes=HEAD_LANES)

    out = pl.pallas_call(
        kernel,
        out_shape=jax.ShapeDtypeStruct((B_pad, HEAD_LANES), jnp.float32),
        in_specs=[pl.BlockSpec(memory_space=pltpu.MemorySpace.VMEM)] * 2,
        out_specs=pl.BlockSpec(memory_space=pltpu.MemorySpace.VMEM),
    )(x_flat, packed)

    return out[:B, :2]


def init_params(key, input_size=9, hidden_size=64):
    """Deterministic synthetic params, PyTorch-like uniform(-1/sqrt(H), 1/sqrt(H))."""
    k = 1.0 / jnp.sqrt(jnp.float32(hidden_size))
    keys = jax.random.split(key, 6)
    u = lambda kk, shape: jax.random.uniform(kk, shape, jnp.float32, -k, k)
    return {
        # stored pre-transposed for the kernel's (row) x (matrix) matmuls
        "w_ih": u(keys[0], (input_size, 4 * hidden_size)),
        "w_hh": u(keys[1], (hidden_size, 4 * hidden_size)),
        "b_ih": u(keys[2], (4 * hidden_size,)),
        "b_hh": u(keys[3], (4 * hidden_size,)),
        "w_fc": u(keys[4], (hidden_size, 2)),
        "b_fc": u(keys[5], (2,)),
    }


def _reference_forward(x, params):
    """Pure-JAX reference (mirrors torch LSTM math, unscaled weights)."""
    B, T, I = x.shape
    H = params["w_hh"].shape[0]
    h = jnp.zeros((B, H), jnp.float32)
    c = jnp.zeros((B, H), jnp.float32)
    b = params["b_ih"] + params["b_hh"]
    for t in range(T):
        gates = x[:, t, :] @ params["w_ih"] + h @ params["w_hh"] + b
        i_g = jax.nn.sigmoid(gates[:, 0 * H:1 * H])
        f_g = jax.nn.sigmoid(gates[:, 1 * H:2 * H])
        g_g = jnp.tanh(gates[:, 2 * H:3 * H])
        o_g = jax.nn.sigmoid(gates[:, 3 * H:4 * H])
        c = f_g * c + i_g * g_g
        h = o_g * jnp.tanh(c)
    return h @ params["w_fc"] + params["b_fc"]


if __name__ == "__main__":
    key = jax.random.PRNGKey(0)
    k_x, k_p = jax.random.split(key)

    B, T, I, H = 2, 8, 9, 64
    x = jax.random.normal(k_x, (B, T, I), jnp.float32)
    params = init_params(k_p, input_size=I, hidden_size=H)

    y = rnn_fall_detector_forward(x, params)
    y = jax.block_until_ready(y)

    y_ref = _reference_forward(x, params)
    assert y.shape == (B, 2)
    assert jnp.allclose(y, y_ref, atol=1e-4, rtol=1e-4)

    print("KERNEL_OK")
</pallas_src>

<mosaic_0001>
module attributes {stable_mosaic.version = 11 : i64} {
  func.func @_lstm_fc_kernel(%arg0: memref<64x16xf32, #tpu.memory_space<vmem>>, %arg1: memref<152x256xf32, #tpu.memory_space<vmem>>, %arg2: memref<8x128xf32, #tpu.memory_space<vmem>>) attributes {dimension_semantics = [], scalar_prefetch = 0 : i64, scratch_operands = 0 : i64, tpu.core_type = #tpu.core_type<tc>} {
    %c0 = arith.constant 0 : index
    %c0_0 = arith.constant 0 : index
    %0 = vector.load %arg1[%c0, %c0_0] : memref<152x256xf32, #tpu.memory_space<vmem>>, vector<16x256xf32>
    %c16 = arith.constant 16 : index
    %c0_1 = arith.constant 0 : index
    %1 = vector.load %arg1[%c16, %c0_1] : memref<152x256xf32, #tpu.memory_space<vmem>>, vector<64x256xf32>
    %c0_2 = arith.constant 0 : index
    %c0_3 = arith.constant 0 : index
    %2 = vector.load %arg0[%c0_2, %c0_3] : memref<64x16xf32, #tpu.memory_space<vmem>>, vector<64x16xf32>
    %cst = arith.constant dense<0.000000e+00> : vector<64x256xf32>
    %3 = tpu.matmul %2, %0, %cst {dimension_numbers = #tpu.dot_dimension_numbers<[1], [0], [0], [1], [0, 0, 1, 1], [], []>} : vector<64x16xf32>, vector<16x256xf32>, vector<64x256xf32> -> vector<64x256xf32>
    %4 = vector.shape_cast %3 : vector<64x256xf32> to vector<8x8x256xf32>
    %cst_4 = arith.constant 0.000000e+00 : f32
    %5 = vector.broadcast %cst_4 : f32 to vector<8x64xf32>
    %cst_5 = arith.constant 0.000000e+00 : f32
    %6 = vector.broadcast %cst_5 : f32 to vector<8x64xf32>
    %7 = vector.extract_strided_slice %4 {offsets = [0, 0, 0], sizes = [1, 8, 256], strides = [1, 1, 1]} : vector<8x8x256xf32> to vector<1x8x256xf32>
    %8 = vector.shape_cast %7 : vector<1x8x256xf32> to vector<8x256xf32>
    %cst_6 = arith.constant dense<0.000000e+00> : vector<8x256xf32>
    %9 = tpu.matmul %5, %1, %cst_6 {dimension_numbers = #tpu.dot_dimension_numbers<[1], [0], [0], [1], [0, 0, 1, 1], [], []>} : vector<8x64xf32>, vector<64x256xf32>, vector<8x256xf32> -> vector<8x256xf32>
    %10 = arith.addf %8, %9 : vector<8x256xf32>
    %11 = arith.negf %10 : vector<8x256xf32>
    %12 = math.exp %11 : vector<8x256xf32>
    %cst_7 = arith.constant 1.000000e+00 : f32
    %13 = vector.broadcast %cst_7 : f32 to vector<8x256xf32>
    %14 = arith.addf %13, %12 : vector<8x256xf32>
    %15 = arith.divf %13, %14 : vector<8x256xf32>
    %16 = vector.extract_strided_slice %15 {offsets = [0, 0], sizes = [8, 64], strides = [1, 1]} : vector<8x256xf32> to vector<8x64xf32>
    %17 = vector.extract_strided_slice %15 {offsets = [0, 64], sizes = [8, 64], strides = [1, 1]} : vector<8x256xf32> to vector<8x64xf32>
    %18 = vector.extract_strided_slice %15 {offsets = [0, 128], sizes = [8, 64], strides = [1, 1]} : vector<8x256xf32> to vector<8x64xf32>
    %cst_8 = arith.constant 2.000000e+00 : f32
    %19 = vector.broadcast %cst_8 : f32 to vector<8x64xf32>
    %20 = arith.mulf %19, %18 : vector<8x64xf32>
    %cst_9 = arith.constant 1.000000e+00 : f32
    %21 = vector.broadcast %cst_9 : f32 to vector<8x64xf32>
    %22 = arith.subf %20, %21 : vector<8x64xf32>
    %23 = vector.extract_strided_slice %15 {offsets = [0, 192], sizes = [8, 64], strides = [1, 1]} : vector<8x256xf32> to vector<8x64xf32>
    %24 = arith.mulf %17, %6 : vector<8x64xf32>
    %25 = arith.mulf %16, %22 : vector<8x64xf32>
    %26 = arith.addf %24, %25 : vector<8x64xf32>
    %27 = math.tanh %26 : vector<8x64xf32>
    %28 = arith.mulf %23, %27 : vector<8x64xf32>
    %29 = vector.extract_strided_slice %4 {offsets = [1, 0, 0], sizes = [1, 8, 256], strides = [1, 1, 1]} : vector<8x8x256xf32> to vector<1x8x256xf32>
    %30 = vector.shape_cast %29 : vector<1x8x256xf32> to vector<8x256xf32>
    %cst_10 = arith.constant dense<0.000000e+00> : vector<8x256xf32>
    %31 = tpu.matmul %28, %1, %cst_10 {dimension_numbers = #tpu.dot_dimension_numbers<[1], [0], [0], [1], [0, 0, 1, 1], [], []>} : vector<8x64xf32>, vector<64x256xf32>, vector<8x256xf32> -> vector<8x256xf32>
    %32 = arith.addf %30, %31 : vector<8x256xf32>
    %33 = arith.negf %32 : vector<8x256xf32>
    %34 = math.exp %33 : vector<8x256xf32>
    %cst_11 = arith.constant 1.000000e+00 : f32
    %35 = vector.broadcast %cst_11 : f32 to vector<8x256xf32>
    %36 = arith.addf %35, %34 : vector<8x256xf32>
    %37 = arith.divf %35, %36 : vector<8x256xf32>
    %38 = vector.extract_strided_slice %37 {offsets = [0, 0], sizes = [8, 64], strides = [1, 1]} : vector<8x256xf32> to vector<8x64xf32>
    %39 = vector.extract_strided_slice %37 {offsets = [0, 64], sizes = [8, 64], strides = [1, 1]} : vector<8x256xf32> to vector<8x64xf32>
    %40 = vector.extract_strided_slice %37 {offsets = [0, 128], sizes = [8, 64], strides = [1, 1]} : vector<8x256xf32> to vector<8x64xf32>
    %cst_12 = arith.constant 2.000000e+00 : f32
    %41 = vector.broadcast %cst_12 : f32 to vector<8x64xf32>
    %42 = arith.mulf %41, %40 : vector<8x64xf32>
    %cst_13 = arith.constant 1.000000e+00 : f32
    %43 = vector.broadcast %cst_13 : f32 to vector<8x64xf32>
    %44 = arith.subf %42, %43 : vector<8x64xf32>
    %45 = vector.extract_strided_slice %37 {offsets = [0, 192], sizes = [8, 64], strides = [1, 1]} : vector<8x256xf32> to vector<8x64xf32>
    %46 = arith.mulf %39, %26 : vector<8x64xf32>
    %47 = arith.mulf %38, %44 : vector<8x64xf32>
    %48 = arith.addf %46, %47 : vector<8x64xf32>
    %49 = math.tanh %48 : vector<8x64xf32>
    %50 = arith.mulf %45, %49 : vector<8x64xf32>
    %51 = vector.extract_strided_slice %4 {offsets = [2, 0, 0], sizes = [1, 8, 256], strides = [1, 1, 1]} : vector<8x8x256xf32> to vector<1x8x256xf32>
    %52 = vector.shape_cast %51 : vector<1x8x256xf32> to vector<8x256xf32>
    %cst_14 = arith.constant dense<0.000000e+00> : vector<8x256xf32>
    %53 = tpu.matmul %50, %1, %cst_14 {dimension_numbers = #tpu.dot_dimension_numbers<[1], [0], [0], [1], [0, 0, 1, 1], [], []>} : vector<8x64xf32>, vector<64x256xf32>, vector<8x256xf32> -> vector<8x256xf32>
    %54 = arith.addf %52, %53 : vector<8x256xf32>
    %55 = arith.negf %54 : vector<8x256xf32>
    %56 = math.exp %55 : vector<8x256xf32>
    %cst_15 = arith.constant 1.000000e+00 : f32
    %57 = vector.broadcast %cst_15 : f32 to vector<8x256xf32>
    %58 = arith.addf %57, %56 : vector<8x256xf32>
    %59 = arith.divf %57, %58 : vector<8x256xf32>
    %60 = vector.extract_strided_slice %59 {offsets = [0, 0], sizes = [8, 64], strides = [1, 1]} : vector<8x256xf32> to vector<8x64xf32>
    %61 = vector.extract_strided_slice %59 {offsets = [0, 64], sizes = [8, 64], strides = [1, 1]} : vector<8x256xf32> to vector<8x64xf32>
    %62 = vector.extract_strided_slice %59 {offsets = [0, 128], sizes = [8, 64], strides = [1, 1]} : vector<8x256xf32> to vector<8x64xf32>
    %cst_16 = arith.constant 2.000000e+00 : f32
    %63 = vector.broadcast %cst_16 : f32 to vector<8x64xf32>
    %64 = arith.mulf %63, %62 : vector<8x64xf32>
    %cst_17 = arith.constant 1.000000e+00 : f32
    %65 = vector.broadcast %cst_17 : f32 to vector<8x64xf32>
    %66 = arith.subf %64, %65 : vector<8x64xf32>
    %67 = vector.extract_strided_slice %59 {offsets = [0, 192], sizes = [8, 64], strides = [1, 1]} : vector<8x256xf32> to vector<8x64xf32>
    %68 = arith.mulf %61, %48 : vector<8x64xf32>
    %69 = arith.mulf %60, %66 : vector<8x64xf32>
    %70 = arith.addf %68, %69 : vector<8x64xf32>
    %71 = math.tanh %70 : vector<8x64xf32>
    %72 = arith.mulf %67, %71 : vector<8x64xf32>
    %73 = vector.extract_strided_slice %4 {offsets = [3, 0, 0], sizes = [1, 8, 256], strides = [1, 1, 1]} : vector<8x8x256xf32> to vector<1x8x256xf32>
    %74 = vector.shape_cast %73 : vector<1x8x256xf32> to vector<8x256xf32>
    %cst_18 = arith.constant dense<0.000000e+00> : vector<8x256xf32>
    %75 = tpu.matmul %72, %1, %cst_18 {dimension_numbers = #tpu.dot_dimension_numbers<[1], [0], [0], [1], [0, 0, 1, 1], [], []>} : vector<8x64xf32>, vector<64x256xf32>, vector<8x256xf32> -> vector<8x256xf32>
    %76 = arith.addf %74, %75 : vector<8x256xf32>
    %77 = arith.negf %76 : vector<8x256xf32>
    %78 = math.exp %77 : vector<8x256xf32>
    %cst_19 = arith.constant 1.000000e+00 : f32
    %79 = vector.broadcast %cst_19 : f32 to vector<8x256xf32>
    %80 = arith.addf %79, %78 : vector<8x256xf32>
    %81 = arith.divf %79, %80 : vector<8x256xf32>
    %82 = vector.extract_strided_slice %81 {offsets = [0, 0], sizes = [8, 64], strides = [1, 1]} : vector<8x256xf32> to vector<8x64xf32>
    %83 = vector.extract_strided_slice %81 {offsets = [0, 64], sizes = [8, 64], strides = [1, 1]} : vector<8x256xf32> to vector<8x64xf32>
    %84 = vector.extract_strided_slice %81 {offsets = [0, 128], sizes = [8, 64], strides = [1, 1]} : vector<8x256xf32> to vector<8x64xf32>
    %cst_20 = arith.constant 2.000000e+00 : f32
    %85 = vector.broadcast %cst_20 : f32 to vector<8x64xf32>
    %86 = arith.mulf %85, %84 : vector<8x64xf32>
    %cst_21 = arith.constant 1.000000e+00 : f32
    %87 = vector.broadcast %cst_21 : f32 to vector<8x64xf32>
    %88 = arith.subf %86, %87 : vector<8x64xf32>
    %89 = vector.extract_strided_slice %81 {offsets = [0, 192], sizes = [8, 64], strides = [1, 1]} : vector<8x256xf32> to vector<8x64xf32>
    %90 = arith.mulf %83, %70 : vector<8x64xf32>
    %91 = arith.mulf %82, %88 : vector<8x64xf32>
    %92 = arith.addf %90, %91 : vector<8x64xf32>
    %93 = math.tanh %92 : vector<8x64xf32>
    %94 = arith.mulf %89, %93 : vector<8x64xf32>
    %95 = vector.extract_strided_slice %4 {offsets = [4, 0, 0], sizes = [1, 8, 256], strides = [1, 1, 1]} : vector<8x8x256xf32> to vector<1x8x256xf32>
    %96 = vector.shape_cast %95 : vector<1x8x256xf32> to vector<8x256xf32>
    %cst_22 = arith.constant dense<0.000000e+00> : vector<8x256xf32>
    %97 = tpu.matmul %94, %1, %cst_22 {dimension_numbers = #tpu.dot_dimension_numbers<[1], [0], [0], [1], [0, 0, 1, 1], [], []>} : vector<8x64xf32>, vector<64x256xf32>, vector<8x256xf32> -> vector<8x256xf32>
    %98 = arith.addf %96, %97 : vector<8x256xf32>
    %99 = arith.negf %98 : vector<8x256xf32>
    %100 = math.exp %99 : vector<8x256xf32>
    %cst_23 = arith.constant 1.000000e+00 : f32
    %101 = vector.broadcast %cst_23 : f32 to vector<8x256xf32>
    %102 = arith.addf %101, %100 : vector<8x256xf32>
    %103 = arith.divf %101, %102 : vector<8x256xf32>
    %104 = vector.extract_strided_slice %103 {offsets = [0, 0], sizes = [8, 64], strides = [1, 1]} : vector<8x256xf32> to vector<8x64xf32>
    %105 = vector.extract_strided_slice %103 {offsets = [0, 64], sizes = [8, 64], strides = [1, 1]} : vector<8x256xf32> to vector<8x64xf32>
    %106 = vector.extract_strided_slice %103 {offsets = [0, 128], sizes = [8, 64], strides = [1, 1]} : vector<8x256xf32> to vector<8x64xf32>
    %cst_24 = arith.constant 2.000000e+00 : f32
    %107 = vector.broadcast %cst_24 : f32 to vector<8x64xf32>
    %108 = arith.mulf %107, %106 : vector<8x64xf32>
    %cst_25 = arith.constant 1.000000e+00 : f32
    %109 = vector.broadcast %cst_25 : f32 to vector<8x64xf32>
    %110 = arith.subf %108, %109 : vector<8x64xf32>
    %111 = vector.extract_strided_slice %103 {offsets = [0, 192], sizes = [8, 64], strides = [1, 1]} : vector<8x256xf32> to vector<8x64xf32>
    %112 = arith.mulf %105, %92 : vector<8x64xf32>
    %113 = arith.mulf %104, %110 : vector<8x64xf32>
    %114 = arith.addf %112, %113 : vector<8x64xf32>
    %115 = math.tanh %114 : vector<8x64xf32>
    %116 = arith.mulf %111, %115 : vector<8x64xf32>
    %117 = vector.extract_strided_slice %4 {offsets = [5, 0, 0], sizes = [1, 8, 256], strides = [1, 1, 1]} : vector<8x8x256xf32> to vector<1x8x256xf32>
    %118 = vector.shape_cast %117 : vector<1x8x256xf32> to vector<8x256xf32>
    %cst_26 = arith.constant dense<0.000000e+00> : vector<8x256xf32>
    %119 = tpu.matmul %116, %1, %cst_26 {dimension_numbers = #tpu.dot_dimension_numbers<[1], [0], [0], [1], [0, 0, 1, 1], [], []>} : vector<8x64xf32>, vector<64x256xf32>, vector<8x256xf32> -> vector<8x256xf32>
    %120 = arith.addf %118, %119 : vector<8x256xf32>
    %121 = arith.negf %120 : vector<8x256xf32>
    %122 = math.exp %121 : vector<8x256xf32>
    %cst_27 = arith.constant 1.000000e+00 : f32
    %123 = vector.broadcast %cst_27 : f32 to vector<8x256xf32>
    %124 = arith.addf %123, %122 : vector<8x256xf32>
    %125 = arith.divf %123, %124 : vector<8x256xf32>
    %126 = vector.extract_strided_slice %125 {offsets = [0, 0], sizes = [8, 64], strides = [1, 1]} : vector<8x256xf32> to vector<8x64xf32>
    %127 = vector.extract_strided_slice %125 {offsets = [0, 64], sizes = [8, 64], strides = [1, 1]} : vector<8x256xf32> to vector<8x64xf32>
    %128 = vector.extract_strided_slice %125 {offsets = [0, 128], sizes = [8, 64], strides = [1, 1]} : vector<8x256xf32> to vector<8x64xf32>
    %cst_28 = arith.constant 2.000000e+00 : f32
    %129 = vector.broadcast %cst_28 : f32 to vector<8x64xf32>
    %130 = arith.mulf %129, %128 : vector<8x64xf32>
    %cst_29 = arith.constant 1.000000e+00 : f32
    %131 = vector.broadcast %cst_29 : f32 to vector<8x64xf32>
    %132 = arith.subf %130, %131 : vector<8x64xf32>
    %133 = vector.extract_strided_slice %125 {offsets = [0, 192], sizes = [8, 64], strides = [1, 1]} : vector<8x256xf32> to vector<8x64xf32>
    %134 = arith.mulf %127, %114 : vector<8x64xf32>
    %135 = arith.mulf %126, %132 : vector<8x64xf32>
    %136 = arith.addf %134, %135 : vector<8x64xf32>
    %137 = math.tanh %136 : vector<8x64xf32>
    %138 = arith.mulf %133, %137 : vector<8x64xf32>
    %139 = vector.extract_strided_slice %4 {offsets = [6, 0, 0], sizes = [1, 8, 256], strides = [1, 1, 1]} : vector<8x8x256xf32> to vector<1x8x256xf32>
    %140 = vector.shape_cast %139 : vector<1x8x256xf32> to vector<8x256xf32>
    %cst_30 = arith.constant dense<0.000000e+00> : vector<8x256xf32>
    %141 = tpu.matmul %138, %1, %cst_30 {dimension_numbers = #tpu.dot_dimension_numbers<[1], [0], [0], [1], [0, 0, 1, 1], [], []>} : vector<8x64xf32>, vector<64x256xf32>, vector<8x256xf32> -> vector<8x256xf32>
    %142 = arith.addf %140, %141 : vector<8x256xf32>
    %143 = arith.negf %142 : vector<8x256xf32>
    %144 = math.exp %143 : vector<8x256xf32>
    %cst_31 = arith.constant 1.000000e+00 : f32
    %145 = vector.broadcast %cst_31 : f32 to vector<8x256xf32>
    %146 = arith.addf %145, %144 : vector<8x256xf32>
    %147 = arith.divf %145, %146 : vector<8x256xf32>
    %148 = vector.extract_strided_slice %147 {offsets = [0, 0], sizes = [8, 64], strides = [1, 1]} : vector<8x256xf32> to vector<8x64xf32>
    %149 = vector.extract_strided_slice %147 {offsets = [0, 64], sizes = [8, 64], strides = [1, 1]} : vector<8x256xf32> to vector<8x64xf32>
    %150 = vector.extract_strided_slice %147 {offsets = [0, 128], sizes = [8, 64], strides = [1, 1]} : vector<8x256xf32> to vector<8x64xf32>
    %cst_32 = arith.constant 2.000000e+00 : f32
    %151 = vector.broadcast %cst_32 : f32 to vector<8x64xf32>
    %152 = arith.mulf %151, %150 : vector<8x64xf32>
    %cst_33 = arith.constant 1.000000e+00 : f32
    %153 = vector.broadcast %cst_33 : f32 to vector<8x64xf32>
    %154 = arith.subf %152, %153 : vector<8x64xf32>
    %155 = vector.extract_strided_slice %147 {offsets = [0, 192], sizes = [8, 64], strides = [1, 1]} : vector<8x256xf32> to vector<8x64xf32>
    %156 = arith.mulf %149, %136 : vector<8x64xf32>
    %157 = arith.mulf %148, %154 : vector<8x64xf32>
    %158 = arith.addf %156, %157 : vector<8x64xf32>
    %159 = math.tanh %158 : vector<8x64xf32>
    %160 = arith.mulf %155, %159 : vector<8x64xf32>
    %161 = vector.extract_strided_slice %4 {offsets = [7, 0, 0], sizes = [1, 8, 256], strides = [1, 1, 1]} : vector<8x8x256xf32> to vector<1x8x256xf32>
    %162 = vector.shape_cast %161 : vector<1x8x256xf32> to vector<8x256xf32>
    %cst_34 = arith.constant dense<0.000000e+00> : vector<8x256xf32>
    %163 = tpu.matmul %160, %1, %cst_34 {dimension_numbers = #tpu.dot_dimension_numbers<[1], [0], [0], [1], [0, 0, 1, 1], [], []>} : vector<8x64xf32>, vector<64x256xf32>, vector<8x256xf32> -> vector<8x256xf32>
    %164 = arith.addf %162, %163 : vector<8x256xf32>
    %165 = arith.negf %164 : vector<8x256xf32>
    %166 = math.exp %165 : vector<8x256xf32>
    %cst_35 = arith.constant 1.000000e+00 : f32
    %167 = vector.broadcast %cst_35 : f32 to vector<8x256xf32>
    %168 = arith.addf %167, %166 : vector<8x256xf32>
    %169 = arith.divf %167, %168 : vector<8x256xf32>
    %170 = vector.extract_strided_slice %169 {offsets = [0, 0], sizes = [8, 64], strides = [1, 1]} : vector<8x256xf32> to vector<8x64xf32>
    %171 = vector.extract_strided_slice %169 {offsets = [0, 64], sizes = [8, 64], strides = [1, 1]} : vector<8x256xf32> to vector<8x64xf32>
    %172 = vector.extract_strided_slice %169 {offsets = [0, 128], sizes = [8, 64], strides = [1, 1]} : vector<8x256xf32> to vector<8x64xf32>
    %cst_36 = arith.constant 2.000000e+00 : f32
    %173 = vector.broadcast %cst_36 : f32 to vector<8x64xf32>
    %174 = arith.mulf %173, %172 : vector<8x64xf32>
    %cst_37 = arith.constant 1.000000e+00 : f32
    %175 = vector.broadcast %cst_37 : f32 to vector<8x64xf32>
    %176 = arith.subf %174, %175 : vector<8x64xf32>
    %177 = vector.extract_strided_slice %169 {offsets = [0, 192], sizes = [8, 64], strides = [1, 1]} : vector<8x256xf32> to vector<8x64xf32>
    %178 = arith.mulf %171, %158 : vector<8x64xf32>
    %179 = arith.mulf %170, %176 : vector<8x64xf32>
    %180 = arith.addf %178, %179 : vector<8x64xf32>
    %181 = math.tanh %180 : vector<8x64xf32>
    %182 = arith.mulf %177, %181 : vector<8x64xf32>
    %c80 = arith.constant 80 : index
    %c0_38 = arith.constant 0 : index
    %183 = vector.load %arg1[%c80, %c0_38] : memref<152x256xf32, #tpu.memory_space<vmem>>, vector<64x128xf32>
    %c144 = arith.constant 144 : index
    %c0_39 = arith.constant 0 : index
    %184 = vector.load %arg1[%c144, %c0_39] : memref<152x256xf32, #tpu.memory_space<vmem>>, vector<8x128xf32>
    %cst_40 = arith.constant dense<0.000000e+00> : vector<8x128xf32>
    %185 = tpu.matmul %182, %183, %cst_40 {dimension_numbers = #tpu.dot_dimension_numbers<[1], [0], [0], [1], [0, 0, 1, 1], [], []>} : vector<8x64xf32>, vector<64x128xf32>, vector<8x128xf32> -> vector<8x128xf32>
    %186 = arith.addf %185, %184 : vector<8x128xf32>
    %c0_41 = arith.constant 0 : index
    %c0_42 = arith.constant 0 : index
    %187 = vector.load %arg2[%c0_41, %c0_42] : memref<8x128xf32, #tpu.memory_space<vmem>>, vector<8x128xf32>
    tpu.vector_store %arg2[%c0_41, %c0_42], %186 {strides = array<i32>} : memref<8x128xf32, #tpu.memory_space<vmem>>, vector<8x128xf32>,
    return
  }
}

</mosaic_0001>

<bundles_post_ra>
// kernel: tpu_custom_call.1
= control target key start
LH: loop header
LB: loop body
LE: loop exit
PB: predicated region body
PF: predicated region fallthrough
CT: control target
= control target key end

     0   :  { %7 = vsyncpa [#allocation3], 0  ;;  %s1471_s0 = inlined_call_operand.vmem [shape: f32[64,16], index: 0, kind: input, shape index: {}]   ;;  %s1472_s1 = inlined_call_operand.hbm [shape: f32[152,256], index: 1, kind: input, shape index: {}]   ;;  %s1473_s2 = inlined_call_operand.hbm [shape: f32[8,128], index: 2, kind: output, shape index: {}]  }
   0x1   :  { %8 = vsyncpa [#allocation4], 0  ;;  %s15_s11 = sshll.u32 %s1472_s1, 4  ;;  %s1175_s12 = smov [#allocation2]   ;;  %s16_s11 = int_to_ptr.hbm [resolvable:$true] %s15_s11 }
   0x2   :  { %s17_s13 = sshll.u32 %s1175_s12, 4  ;;  %s1176_s14 = smov 256   ;;  %s18_s13 = int_to_ptr.vmem [resolvable:$true] %s17_s13 }
   0x3   :  { %s1177_s15 = smov 16  }
   0x4   :  { %23 = dma.hbm_to_vmem [thread:$0]  %s16_s11, 4864, %s18_s13, [#allocation3], %s1176_s14, %s1176_s14, %s1177_s15  }
   0x5   :  { %1171 = dma.done.wait [#allocation3], 4864  }
   0x6   :  { %1172 = vsyncadd [#allocation3], 4294962432  ;;  %v1199_v0 = vld [vmem:[#allocation2 + $0x90] sm:$0xff]  ;;  %v1201_v1 = vld [vmem:[#allocation2 + $0x98] sm:$0xff]  ;;  %vm56_vm0 = vcmask 130048   ;;  %v1178_v21 = vmov 0.0  }
   0x7   :  { %v1203_v2 = vld [vmem:[#allocation2 + $0x80] sm:$0xff]  ;;  %175 = vmatpush.msra.mxu2 %v1199_v0  ;;  %195 = vmatpush.msra.mxu3 %v1201_v1  ;;  %v1207_v3 = vld [vmem:[#allocation2 + $0x88] sm:$0xff]  ;;  %v1209_v4 = vld [vmem:[#allocation2 + $0x70] sm:$0xff]  ;;  %s1179_s17 = smov 64   ;;  %vm163_vm9 = vcmask 523264   ;;  %s972_s7 = sshll.u32 %s1473_s2, 4  ;;  %s973_s7 = int_to_ptr.hbm [resolvable:$true] %s972_s7 }
   0x8   :  { %v1211_v5 = vld [vmem:[#allocation2 + $0x78] sm:$0xff]  ;;  %v1215_v6 = vld [vmem:[#allocation2 + $0x60] sm:$0xff]  ;;  %v1217_v7 = vld [vmem:[#allocation2 + $0x68] sm:$0xff] }
   0x9   :  { %176 = vmatpush.msra.mxu2 %v1203_v2  ;;  %196 = vmatpush.msra.mxu3 %v1207_v3  ;;  %v1221_v8 = vld [vmem:[#allocation2 + $0x50] sm:$0xff]  ;;  %v31_v10 = vld [vmem:[#allocation2 + $0x18] sm:$0xff]  ;;  %v28_v12 = vld [vmem:[#allocation2] sm:$0xff] }
   0xa   :  { %v30_v9 = vld [vmem:[#allocation2 + $0x10] sm:$0xff]  ;;  %v1223_v11 = vld [vmem:[#allocation2 + $0x58] sm:$0xff]  ;;  %136 = vmatpush.msra.mxu1 %v31_v10  ;;  %v29_v13 = vld [vmem:[#allocation2 + $0x8] sm:$0xff] }
   0xb   :  { %177 = vmatpush.msra.mxu2 %v1209_v4  ;;  %197 = vmatpush.msra.mxu3 %v1211_v5  ;;  %v48_v14 = vld [vmem:[%s1471_s0] sm:$0xff]  ;;  %v1232_v16 = vld [vmem:[#allocation2 + $0x48] sm:$0xff]  ;;  %v1236_v17 = vld [vmem:[#allocation2 + $0x30] sm:$0xff] }
   0xc   :  { %95 = vmatpush.msra.mxu0 %v30_v9  ;;  %v1230_v15 = vld [vmem:[#allocation2 + $0x40] sm:$0xff]  ;;  %137 = vmatpush.msra.mxu1 %v29_v13  ;;  %v1238_v18 = vld [vmem:[#allocation2 + $0x38] sm:$0xff]  ;;  %v1246_v20 = vld [vmem:[#allocation2 + $0x28] sm:$0xff] }
   0xd   :  { %178 = vmatpush.msra.mxu2 %v1215_v6  ;;  %198 = vmatpush.msra.mxu3 %v1217_v7  ;;  %v1244_v19 = vld [vmem:[#allocation2 + $0x20] sm:$0xff]  ;;  %v49_v62 = vld [vmem:[%s1471_s0 + $0x8] sm:$0xff] }
   0xe   :  { %96 = vmatpush.msra.mxu0 %v28_v12  ;;  %990 = vmatmul.msk.f32.vlgmr.msra.gmra.mxu1 %vm56_vm0, %v48_v14 }
   0xf   :  { %179 = vmatpush.msra.mxu2 %v1221_v8  ;;  %199 = vmatpush.msra.mxu3 %v1223_v11 }
  0x10   :  { %982 = vmatmul.msk.f32.vlgmr.msra.gmra.mxu0 %vm56_vm0, %v48_v14  ;;  %579 = vmatpush.msrb.mxu1 %v1201_v1 }
  0x11   :  { %180 = vmatpush.msra.mxu2 %v1230_v15  ;;  %200 = vmatpush.msra.mxu3 %v1232_v16 }
  0x12   :  { %559 = vmatpush.msrb.mxu0 %v1199_v0  ;;  %580 = vmatpush.msrb.mxu1 %v1207_v3 }
  0x13   :  { %181 = vmatpush.msra.mxu2 %v1236_v17  ;;  %201 = vmatpush.msra.mxu3 %v1238_v18 }
  0x14   :  { %560 = vmatpush.msrb.mxu0 %v1203_v2  ;;  %581 = vmatpush.msrb.mxu1 %v1211_v5 }
  0x15   :  { %182 = vmatpush.msra.mxu2 %v1244_v19  ;;  %202 = vmatpush.msra.mxu3 %v1246_v20 }
  0x16   :  { %183 = vmatmul.f32.vlgmr.msra.gmra.mxu2 %v1178_v21  ;;  %203 = vmatmul.f32.vlgmr.msra.gmra.mxu3 %v1178_v21 }
  0x17   :  { %271 = vmatpush.msrb.mxu2 %v1199_v0  ;;  %291 = vmatpush.msrb.mxu3 %v1201_v1 }
  0x18   :  { %561 = vmatpush.msrb.mxu0 %v1209_v4  ;;  %582 = vmatpush.msrb.mxu1 %v1217_v7 }
  0x19   :  { %272 = vmatpush.msrb.mxu2 %v1203_v2  ;;  %292 = vmatpush.msrb.mxu3 %v1207_v3 }
  0x1a   :  { %562 = vmatpush.msrb.mxu0 %v1215_v6  ;;  %583 = vmatpush.msrb.mxu1 %v1223_v11 }
  0x1b   :  { %273 = vmatpush.msrb.mxu2 %v1209_v4  ;;  %293 = vmatpush.msrb.mxu3 %v1211_v5 }
  0x1c   :  { %563 = vmatpush.msrb.mxu0 %v1221_v8  ;;  %584 = vmatpush.msrb.mxu1 %v1232_v16 }
  0x1d   :  { %274 = vmatpush.msrb.mxu2 %v1215_v6  ;;  %294 = vmatpush.msrb.mxu3 %v1217_v7 }
  0x1e   :  { %564 = vmatpush.msrb.mxu0 %v1230_v15  ;;  %585 = vmatpush.msrb.mxu1 %v1238_v18 }
  0x1f   :  { %275 = vmatpush.msrb.mxu2 %v1221_v8  ;;  %295 = vmatpush.msrb.mxu3 %v1223_v11 }
  0x20   :  { %565 = vmatpush.msrb.mxu0 %v1236_v17  ;;  %586 = vmatpush.msrb.mxu1 %v1246_v20 }
  0x21   :  { %276 = vmatpush.msrb.mxu2 %v1230_v15  ;;  %296 = vmatpush.msrb.mxu3 %v1232_v16 }
  0x22   :  { %566 = vmatpush.msrb.mxu0 %v1244_v19  ;;  %771 = vmatpush.msra.mxu1 %v1201_v1 }
  0x23   :  { %277 = vmatpush.msrb.mxu2 %v1236_v17  ;;  %297 = vmatpush.msrb.mxu3 %v1238_v18 }
  0x24   :  { %751 = vmatpush.msra.mxu0 %v1199_v0  ;;  %772 = vmatpush.msra.mxu1 %v1207_v3 }
  0x25   :  { %278 = vmatpush.msrb.mxu2 %v1244_v19  ;;  %298 = vmatpush.msrb.mxu3 %v1246_v20 }
  0x26   :  { %752 = vmatpush.msra.mxu0 %v1203_v2  ;;  %773 = vmatpush.msra.mxu1 %v1211_v5 }
  0x27   :  { %367 = vmatpush.msra.mxu2 %v1199_v0  ;;  %387 = vmatpush.msra.mxu3 %v1201_v1 }
  0x28   :  { %753 = vmatpush.msra.mxu0 %v1209_v4  ;;  %774 = vmatpush.msra.mxu1 %v1217_v7 }
  0x29   :  { %368 = vmatpush.msra.mxu2 %v1203_v2  ;;  %388 = vmatpush.msra.mxu3 %v1207_v3 }
  0x2a   :  { %754 = vmatpush.msra.mxu0 %v1215_v6  ;;  %775 = vmatpush.msra.mxu1 %v1223_v11 }
  0x2b   :  { %369 = vmatpush.msra.mxu2 %v1209_v4  ;;  %389 = vmatpush.msra.mxu3 %v1211_v5 }
  0x2c   :  { %755 = vmatpush.msra.mxu0 %v1221_v8  ;;  %776 = vmatpush.msra.mxu1 %v1232_v16 }
  0x2d   :  { %370 = vmatpush.msra.mxu2 %v1215_v6  ;;  %390 = vmatpush.msra.mxu3 %v1217_v7 }
  0x2e   :  { %756 = vmatpush.msra.mxu0 %v1230_v15  ;;  %777 = vmatpush.msra.mxu1 %v1238_v18 }
  0x2f   :  { %371 = vmatpush.msra.mxu2 %v1221_v8  ;;  %391 = vmatpush.msra.mxu3 %v1223_v11 }
  0x30   :  { %757 = vmatpush.msra.mxu0 %v1236_v17  ;;  %778 = vmatpush.msra.mxu1 %v1246_v20 }
  0x31   :  { %372 = vmatpush.msra.mxu2 %v1230_v15  ;;  %392 = vmatpush.msra.mxu3 %v1232_v16 }
  0x32   :  { %758 = vmatpush.msra.mxu0 %v1244_v19  ;;  %991 = vmatmul.msk.f32.gmra.mxu1 %vm56_vm0, %v49_v62 }
  0x33   :  { %373 = vmatpush.msra.mxu2 %v1236_v17  ;;  %393 = vmatpush.msra.mxu3 %v1238_v18 }
  0x34   :  { %983 = vmatmul.msk.f32.gmra.mxu0 %vm56_vm0, %v49_v62 }
  0x35   :  { %374 = vmatpush.msra.mxu2 %v1244_v19  ;;  %394 = vmatpush.msra.mxu3 %v1246_v20 }
  0x8b   :  { %v139_v23 = vpop.f32.mrf.mxu1 }
  0x8d   :  { %v98_v22 = vpop.f32.mrf.mxu0 }
  0x99   :  { %v184_v24 = vpop.f32.mrf.mxu2  ;;  %v204_v25 = vpop.f32.mrf.mxu3 }
  0x9a   :  { %v207_v26 = vadd.f32 %v184_v24, %v98_v22  ;;  %v208_v27 = vadd.f32 %v204_v25, %v139_v23 }
  0x9c   :  { %v998_v28 = vmul.f32 -1.442695, %v207_v26  ;;  %v999_v29 = vmul.f32 -1.442695, %v208_v27 }
  0x9e   :  { %1043 = vpow2.f32 %v998_v28 }
  0x9f   :  { %1045 = vpow2.f32 %v999_v29 }
  0xa4   :  { %v1044_v30 = vpop.eup %1043 }
  0xa5   :  { %v1046_v31 = vpop.eup %1045  ;;  %v215_v32 = vadd.f32 1.0, %v1044_v30 }
  0xa6   :  { %v216_v33 = vadd.f32 1.0, %v1046_v31 }
  0xa7   :  { %1047 = vrcp.f32 %v215_v32  ;;  %v228_v46 = vand.u32 2147483648, %v215_v32  ;;  %vm222_vm5 = vweird.f32 %v215_v32  ;;  %v226_v48 = vand.u32 2147483647, %v215_v32 }
  0xa8   :  { %1049 = vrcp.f32 %v216_v33  ;;  %v243_v41 = vand.u32 2147483648, %v216_v33  ;;  %v241_v43 = vand.u32 2147483647, %v216_v33  ;;  %vm237_vm3 = vweird.f32 %v216_v33 }
  0xa9   :  { %v229_v53 = vor.u32 1.1754944e-38, %v228_v46  ;;  %vm227_vm8 = vcmp.eq.f32.partialorder %v226_v48, 8.507059e+37 }
  0xaa   :  { %v244_v47 = vor.u32 1.1754944e-38, %v243_v41  ;;  %vm242_vm6 = vcmp.eq.f32.partialorder %v241_v43, 8.507059e+37 }
  0xad   :  { %v1048_v34 = vpop.eup %1047 }
  0xae   :  { %v1050_v35 = vpop.eup %1049  ;;  %v218_v36 = vmul.f32 %v1048_v34, %v215_v32  ;;  %vm223_vm2 = vweird.f32 %v1048_v34 }
  0xaf   :  { %v233_v37 = vmul.f32 %v1050_v35, %v216_v33  ;;  %vm238_vm1 = vweird.f32 %v1050_v35  ;;  %vm224_vm7 = vmor %vm222_vm5, %vm223_vm2  ;;  %v142_v10 = vpop.f32.mrf.mxu1 }
  0xb0   :  { %v219_v38 = vsub.f32 1.0, %v218_v36  ;;  %vm239_vm4 = vmor %vm237_vm3, %vm238_vm1 }
  0xb1   :  { %v234_v39 = vsub.f32 1.0, %v233_v37  ;;  %v101_v9 = vpop.f32.mrf.mxu0 }
  0xb2   :  { %v220_v40 = vmul.f32 %v1048_v34, %v219_v38 }
  0xb3   :  { %v235_v42 = vmul.f32 %v1050_v35, %v234_v39 }
  0xb4   :  { %v221_v44 = vadd.f32 %v1048_v34, %v220_v40 }
  0xb5   :  { %v236_v45 = vadd.f32 %v1050_v35, %v235_v42 }
  0xb6   :  { %v225_v51 = vsel %vm224_vm7, %v1048_v34, %v221_v44 }
  0xb7   :  { %v240_v49 = vsel %vm239_vm4, %v1050_v35, %v236_v45  ;;  %v230_v55 = vsel %vm227_vm8, %v229_v53, %v225_v51 }
  0xb8   :  { %v245_v50 = vsel %vm242_vm6, %v244_v47, %v240_v49  ;;  %v249_v57 = vmul.f32 0.0, %v230_v55 }
  0xb9   :  { %v247_v52 = vmul.f32 2.0, %v245_v50 }
  0xbb   :  { %v1000_v54 = vadd.f32 -1.0, %v247_v52 }
  0xbd   :  { %v250_v56 = vmul.f32 %v1000_v54, %v230_v55 }
  0xbf   :  { %252 = vrot.lane.b32.xlu0 %v250_v56, %s1179_s17  ;;  %v50_v56 = vld [vmem:[%s1471_s0 + $0x10] sm:$0xff] }
  0xc0   :  { %984 = vmatmul.msk.f32.gmra.mxu0 %vm56_vm0, %v50_v56  ;;  %992 = vmatmul.msk.f32.gmra.mxu1 %vm56_vm0, %v50_v56 }
 0x131   :  { %v253_v58 = vpop.permute.xlu0 %252 }
 0x132   :  { %v1317_v59 = vadd.f32 %v253_v58, %v249_v57 }
 0x134   :  { %1051 = vtanh.f32 %v1317_v59 }
 0x13a   :  { %v1052_v60 = vpop.eup %1051 }
 0x13b   :  { %v257_v61 = vmul.f32 %v1052_v60, %v245_v50 }
 0x13d   :  { %259 = vrot.lane.b32.xlu0 %v257_v61, %s1179_s17  ;;  %v104_v58 = vpop.f32.mrf.mxu0 }
 0x1af   :  { %v260_v63 = vpop.permute.xlu0 %259 }
 0x1b0   :  { %1001 = vmatmul.msk.f32.vlgmr.msrb.gmra.mxu2 %vm163_vm9, %v260_v63  ;;  %1002 = vmatmul.msk.f32.vlgmr.msrb.gmra.mxu3 %vm163_vm9, %v260_v63 }
 0x1b1   :  { %463 = vmatpush.msrb.mxu2 %v1199_v0  ;;  %483 = vmatpush.msrb.mxu3 %v1201_v1 }
 0x1b3   :  { %464 = vmatpush.msrb.mxu2 %v1203_v2  ;;  %484 = vmatpush.msrb.mxu3 %v1207_v3 }
 0x1b5   :  { %465 = vmatpush.msrb.mxu2 %v1209_v4  ;;  %485 = vmatpush.msrb.mxu3 %v1211_v5 }
 0x1b7   :  { %466 = vmatpush.msrb.mxu2 %v1215_v6  ;;  %486 = vmatpush.msrb.mxu3 %v1217_v7 }
 0x1b9   :  { %467 = vmatpush.msrb.mxu2 %v1221_v8  ;;  %487 = vmatpush.msrb.mxu3 %v1223_v11 }
 0x1bb   :  { %468 = vmatpush.msrb.mxu2 %v1230_v15  ;;  %488 = vmatpush.msrb.mxu3 %v1232_v16 }
 0x1bd   :  { %469 = vmatpush.msrb.mxu2 %v1236_v17  ;;  %489 = vmatpush.msrb.mxu3 %v1238_v18 }
 0x1bf   :  { %470 = vmatpush.msrb.mxu2 %v1244_v19  ;;  %490 = vmatpush.msrb.mxu3 %v1246_v20 }
 0x233   :  { %v280_v12 = vpop.f32.mrf.mxu2  ;;  %v300_v13 = vpop.f32.mrf.mxu3 }
 0x234   :  { %v303_v14 = vadd.f32 %v280_v12, %v101_v9  ;;  %v304_v21 = vadd.f32 %v300_v13, %v142_v10 }
 0x236   :  { %v1003_v22 = vmul.f32 -1.442695, %v303_v14  ;;  %v1004_v23 = vmul.f32 -1.442695, %v304_v21 }
 0x238   :  { %1053 = vpow2.f32 %v1003_v22 }
 0x239   :  { %1055 = vpow2.f32 %v1004_v23 }
 0x23e   :  { %v1054_v24 = vpop.eup %1053 }
 0x23f   :  { %v1056_v25 = vpop.eup %1055  ;;  %v311_v26 = vadd.f32 1.0, %v1054_v24 }
 0x240   :  { %v312_v27 = vadd.f32 1.0, %v1056_v25 }
 0x241   :  { %1057 = vrcp.f32 %v311_v26  ;;  %v324_v40 = vand.u32 2147483648, %v311_v26  ;;  %vm318_vm14 = vweird.f32 %v311_v26  ;;  %v322_v42 = vand.u32 2147483647, %v311_v26 }
 0x242   :  { %1059 = vrcp.f32 %v312_v27  ;;  %v339_v35 = vand.u32 2147483648, %v312_v27  ;;  %v337_v37 = vand.u32 2147483647, %v312_v27  ;;  %vm333_vm12 = vweird.f32 %v312_v27 }
 0x243   :  { %v325_v47 = vor.u32 1.1754944e-38, %v324_v40  ;;  %vm323_vm2 = vcmp.eq.f32.partialorder %v322_v42, 8.507059e+37 }
 0x244   :  { %v340_v41 = vor.u32 1.1754944e-38, %v339_v35  ;;  %vm338_vm15 = vcmp.eq.f32.partialorder %v337_v37, 8.507059e+37 }
 0x247   :  { %v1058_v28 = vpop.eup %1057 }
 0x248   :  { %v1060_v29 = vpop.eup %1059  ;;  %v314_v30 = vmul.f32 %v1058_v28, %v311_v26  ;;  %vm319_vm11 = vweird.f32 %v1058_v28 }
 0x249   :  { %v329_v31 = vmul.f32 %v1060_v29, %v312_v27  ;;  %vm334_vm10 = vweird.f32 %v1060_v29  ;;  %vm320_vm1 = vmor %vm318_vm14, %vm319_vm11 }
 0x24a   :  { %v315_v32 = vsub.f32 1.0, %v314_v30  ;;  %vm335_vm13 = vmor %vm333_vm12, %vm334_vm10 }
 0x24b   :  { %v330_v33 = vsub.f32 1.0, %v329_v31 }
 0x24c   :  { %v316_v34 = vmul.f32 %v1058_v28, %v315_v32 }
 0x24d   :  { %v331_v36 = vmul.f32 %v1060_v29, %v330_v33 }
 0x24e   :  { %v317_v38 = vadd.f32 %v1058_v28, %v316_v34 }
 0x24f   :  { %v332_v39 = vadd.f32 %v1060_v29, %v331_v36 }
 0x250   :  { %v321_v45 = vsel %vm320_vm1, %v1058_v28, %v317_v38 }
 0x251   :  { %v336_v43 = vsel %vm335_vm13, %v1060_v29, %v332_v39  ;;  %v326_v49 = vsel %vm323_vm2, %v325_v47, %v321_v45 }
 0x252   :  { %v341_v44 = vsel %vm338_vm15, %v340_v41, %v336_v43  ;;  %v345_v51 = vmul.f32 %v326_v49, %v1317_v59  ;;  %v145_v59 = vpop.f32.mrf.mxu1 }
 0x253   :  { %v343_v46 = vmul.f32 2.0, %v341_v44 }
 0x255   :  { %v1005_v48 = vadd.f32 -1.0, %v343_v46 }
 0x257   :  { %v346_v50 = vmul.f32 %v1005_v48, %v326_v49 }
 0x259   :  { %348 = vrot.lane.b32.xlu1 %v346_v50, %s1179_s17  ;;  %v51_v50 = vld [vmem:[%s1471_s0 + $0x18] sm:$0xff] }
 0x25a   :  { %985 = vmatmul.msk.f32.gmra.mxu0 %vm56_vm0, %v51_v50  ;;  %993 = vmatmul.msk.f32.gmra.mxu1 %vm56_vm0, %v51_v50 }
 0x2cb   :  { %v349_v52 = vpop.permute.xlu1 %348 }
 0x2cc   :  { %v1346_v53 = vadd.f32 %v349_v52, %v345_v51 }
 0x2ce   :  { %1061 = vtanh.f32 %v1346_v53 }
 0x2d4   :  { %v1062_v54 = vpop.eup %1061 }
 0x2d5   :  { %v353_v55 = vmul.f32 %v1062_v54, %v341_v44 }
 0x2d7   :  { %355 = vrot.lane.b32.xlu1 %v353_v55, %s1179_s17 }
 0x349   :  { %v356_v57 = vpop.permute.xlu1 %355 }
 0x34a   :  { %1006 = vmatmul.msk.f32.vlgmr.msra.gmra.mxu2 %vm163_vm9, %v356_v57  ;;  %1007 = vmatmul.msk.f32.vlgmr.msra.gmra.mxu3 %vm163_vm9, %v356_v57 }
 0x34b   :  { %655 = vmatpush.msra.mxu2 %v1199_v0  ;;  %675 = vmatpush.msra.mxu3 %v1201_v1 }
 0x34d   :  { %656 = vmatpush.msra.mxu2 %v1203_v2  ;;  %676 = vmatpush.msra.mxu3 %v1207_v3 }
 0x34f   :  { %657 = vmatpush.msra.mxu2 %v1209_v4  ;;  %677 = vmatpush.msra.mxu3 %v1211_v5 }
 0x351   :  { %658 = vmatpush.msra.mxu2 %v1215_v6  ;;  %678 = vmatpush.msra.mxu3 %v1217_v7 }
 0x353   :  { %659 = vmatpush.msra.mxu2 %v1221_v8  ;;  %679 = vmatpush.msra.mxu3 %v1223_v11 }
 0x355   :  { %660 = vmatpush.msra.mxu2 %v1230_v15  ;;  %680 = vmatpush.msra.mxu3 %v1232_v16 }
 0x357   :  { %661 = vmatpush.msra.mxu2 %v1236_v17  ;;  %681 = vmatpush.msra.mxu3 %v1238_v18 }
 0x359   :  { %662 = vmatpush.msra.mxu2 %v1244_v19  ;;  %682 = vmatpush.msra.mxu3 %v1246_v20 }
 0x3cd   :  { %v376_v60 = vpop.f32.mrf.mxu2  ;;  %v396_v61 = vpop.f32.mrf.mxu3 }
 0x3ce   :  { %v399_v62 = vadd.f32 %v376_v60, %v104_v58  ;;  %v400_v63 = vadd.f32 %v396_v61, %v145_v59 }
 0x3d0   :  { %v1008_v9 = vmul.f32 -1.442695, %v399_v62  ;;  %v1009_v10 = vmul.f32 -1.442695, %v400_v63 }
 0x3d2   :  { %1063 = vpow2.f32 %v1008_v9 }
 0x3d3   :  { %1065 = vpow2.f32 %v1009_v10 }
 0x3d8   :  { %v1064_v12 = vpop.eup %1063 }
 0x3d9   :  { %v1066_v13 = vpop.eup %1065  ;;  %v407_v14 = vadd.f32 1.0, %v1064_v12 }
 0x3da   :  { %v408_v21 = vadd.f32 1.0, %v1066_v13 }
 0x3db   :  { %1067 = vrcp.f32 %v407_v14  ;;  %v420_v34 = vand.u32 2147483648, %v407_v14  ;;  %vm414_vm7 = vweird.f32 %v407_v14  ;;  %v418_v36 = vand.u32 2147483647, %v407_v14 }
 0x3dc   :  { %1069 = vrcp.f32 %v408_v21  ;;  %v435_v29 = vand.u32 2147483648, %v408_v21  ;;  %v433_v31 = vand.u32 2147483647, %v408_v21  ;;  %vm429_vm5 = vweird.f32 %v408_v21 }
 0x3dd   :  { %v421_v41 = vor.u32 1.1754944e-38, %v420_v34  ;;  %vm419_vm11 = vcmp.eq.f32.partialorder %v418_v36, 8.507059e+37 }
 0x3de   :  { %v436_v35 = vor.u32 1.1754944e-38, %v435_v29  ;;  %vm434_vm8 = vcmp.eq.f32.partialorder %v433_v31, 8.507059e+37  ;;  %v55_v29 = vld [vmem:[%s1471_s0 + $0x38] sm:$0xff] }
 0x3e1   :  { %v1068_v22 = vpop.eup %1067 }
 0x3e2   :  { %v1070_v23 = vpop.eup %1069  ;;  %v410_v24 = vmul.f32 %v1068_v22, %v407_v14  ;;  %vm415_vm4 = vweird.f32 %v1068_v22 }
 0x3e3   :  { %v425_v25 = vmul.f32 %v1070_v23, %v408_v21  ;;  %vm430_vm3 = vweird.f32 %v1070_v23  ;;  %vm416_vm10 = vmor %vm414_vm7, %vm415_vm4 }
 0x3e4   :  { %v411_v26 = vsub.f32 1.0, %v410_v24  ;;  %vm431_vm6 = vmor %vm429_vm5, %vm430_vm3  ;;  %v53_v24 = vld [vmem:[%s1471_s0 + $0x28] sm:$0xff] }
 0x3e5   :  { %v426_v27 = vsub.f32 1.0, %v425_v25  ;;  %v54_v25 = vld [vmem:[%s1471_s0 + $0x30] sm:$0xff] }
 0x3e6   :  { %v412_v28 = vmul.f32 %v1068_v22, %v411_v26 }
 0x3e7   :  { %v427_v30 = vmul.f32 %v1070_v23, %v426_v27 }
 0x3e8   :  { %v413_v32 = vadd.f32 %v1068_v22, %v412_v28 }
 0x3e9   :  { %v428_v33 = vadd.f32 %v1070_v23, %v427_v30 }
 0x3ea   :  { %v417_v39 = vsel %vm416_vm10, %v1068_v22, %v413_v32 }
 0x3eb   :  { %v432_v37 = vsel %vm431_vm6, %v1070_v23, %v428_v33  ;;  %v422_v43 = vsel %vm419_vm11, %v421_v41, %v417_v39  ;;  %v52_v23 = vld [vmem:[%s1471_s0 + $0x20] sm:$0xff]  ;;  %s1180_s0 = smov [#allocation5]  }
 0x3ec   :  { %v437_v38 = vsel %vm434_vm8, %v436_v35, %v432_v37  ;;  %v441_v45 = vmul.f32 %v422_v43, %v1346_v53  ;;  %986 = vmatmul.msk.f32.gmra.mxu0 %vm56_vm0, %v52_v23  ;;  %994 = vmatmul.msk.f32.gmra.mxu1 %vm56_vm0, %v52_v23  ;;  %s970_s4 = sshll.u32 %s1180_s0, 4  ;;  %s971_s4 = int_to_ptr.vmem [resolvable:$true] %s970_s4 }
 0x3ed   :  { %v439_v40 = vmul.f32 2.0, %v437_v38 }
 0x3ef   :  { %v1010_v42 = vadd.f32 -1.0, %v439_v40 }
 0x3f1   :  { %v442_v44 = vmul.f32 %v1010_v42, %v422_v43 }
 0x3f3   :  { %444 = vrot.lane.b32.xlu2 %v442_v44, %s1179_s17 }
 0x3f4   :  { %987 = vmatmul.msk.f32.gmra.mxu0 %vm56_vm0, %v53_v24  ;;  %995 = vmatmul.msk.f32.gmra.mxu1 %vm56_vm0, %v53_v24 }
 0x3fc   :  { %988 = vmatmul.msk.f32.gmra.mxu0 %vm56_vm0, %v54_v25  ;;  %996 = vmatmul.msk.f32.gmra.mxu1 %vm56_vm0, %v54_v25 }
 0x404   :  { %989 = vmatmul.msk.f32.gmra.mxu0 %vm56_vm0, %v55_v29  ;;  %997 = vmatmul.msk.f32.gmra.mxu1 %vm56_vm0, %v55_v29 }
 0x44d   :  { %v445_v46 = vpop.permute.xlu2 %444 }
 0x44e   :  { %v1375_v47 = vadd.f32 %v445_v46, %v441_v45 }
 0x450   :  { %1071 = vtanh.f32 %v1375_v47 }
 0x456   :  { %v1072_v48 = vpop.eup %1071 }
 0x457   :  { %v449_v49 = vmul.f32 %v1072_v48, %v437_v38 }
 0x459   :  { %451 = vrot.lane.b32.xlu2 %v449_v49, %s1179_s17 }
 0x4b3   :  { %v452_v51 = vpop.permute.xlu2 %451 }
 0x4b4   :  { %1011 = vmatmul.msk.f32.vlgmr.msrb.gmra.mxu2 %vm163_vm9, %v452_v51  ;;  %1012 = vmatmul.msk.f32.vlgmr.msrb.gmra.mxu3 %vm163_vm9, %v452_v51 }
 0x4b5   :  { %847 = vmatpush.msrb.mxu2 %v1199_v0  ;;  %867 = vmatpush.msrb.mxu3 %v1201_v1  ;;  %v107_v0 = vpop.f32.mrf.mxu0  ;;  %v148_v1 = vpop.f32.mrf.mxu1 }
 0x4b7   :  { %848 = vmatpush.msrb.mxu2 %v1203_v2  ;;  %868 = vmatpush.msrb.mxu3 %v1207_v3 }
 0x4b9   :  { %849 = vmatpush.msrb.mxu2 %v1209_v4  ;;  %869 = vmatpush.msrb.mxu3 %v1211_v5 }
 0x4bb   :  { %850 = vmatpush.msrb.mxu2 %v1215_v6  ;;  %870 = vmatpush.msrb.mxu3 %v1217_v7 }
 0x4bd   :  { %851 = vmatpush.msrb.mxu2 %v1221_v8  ;;  %871 = vmatpush.msrb.mxu3 %v1223_v11  ;;  %v110_v33 = vpop.f32.mrf.mxu0  ;;  %v151_v34 = vpop.f32.mrf.mxu1 }
 0x4bf   :  { %852 = vmatpush.msrb.mxu2 %v1230_v15  ;;  %872 = vmatpush.msrb.mxu3 %v1232_v16 }
 0x4c1   :  { %853 = vmatpush.msrb.mxu2 %v1236_v17  ;;  %873 = vmatpush.msrb.mxu3 %v1238_v18 }
 0x4c3   :  { %854 = vmatpush.msrb.mxu2 %v1244_v19  ;;  %874 = vmatpush.msrb.mxu3 %v1246_v20 }
 0x4c5   :  { %v1430_v35 = vpop.f32.mrf.mxu0  ;;  %v1432_v36 = vpop.f32.mrf.mxu1 }
 0x4cd   :  { %v1434_v37 = vpop.f32.mrf.mxu0  ;;  %v1436_v38 = vpop.f32.mrf.mxu1 }
 0x4d5   :  { %v1438_v39 = vpop.f32.mrf.mxu0  ;;  %v1440_v40 = vpop.f32.mrf.mxu1 }
 0x537   :  { %v472_v2 = vpop.f32.mrf.mxu2  ;;  %v492_v3 = vpop.f32.mrf.mxu3 }
 0x538   :  { %v495_v4 = vadd.f32 %v472_v2, %v107_v0  ;;  %v496_v5 = vadd.f32 %v492_v3, %v148_v1 }
 0x53a   :  { %v1013_v6 = vmul.f32 -1.442695, %v495_v4  ;;  %v1014_v7 = vmul.f32 -1.442695, %v496_v5 }
 0x53c   :  { %1073 = vpow2.f32 %v1013_v6 }
 0x53d   :  { %1075 = vpow2.f32 %v1014_v7 }
 0x542   :  { %v1074_v8 = vpop.eup %1073 }
 0x543   :  { %v1076_v11 = vpop.eup %1075  ;;  %v503_v15 = vadd.f32 1.0, %v1074_v8 }
 0x544   :  { %v504_v16 = vadd.f32 1.0, %v1076_v11 }
 0x545   :  { %1077 = vrcp.f32 %v503_v15  ;;  %v516_v60 = vand.u32 2147483648, %v503_v15  ;;  %vm510_vm1 = vweird.f32 %v503_v15  ;;  %v514_v62 = vand.u32 2147483647, %v503_v15 }
 0x546   :  { %1079 = vrcp.f32 %v504_v16  ;;  %v531_v55 = vand.u32 2147483648, %v504_v16  ;;  %v529_v57 = vand.u32 2147483647, %v504_v16  ;;  %vm525_vm14 = vweird.f32 %v504_v16 }
 0x547   :  { %v517_v13 = vor.u32 1.1754944e-38, %v516_v60  ;;  %vm515_vm4 = vcmp.eq.f32.partialorder %v514_v62, 8.507059e+37 }
 0x548   :  { %v532_v61 = vor.u32 1.1754944e-38, %v531_v55  ;;  %vm530_vm2 = vcmp.eq.f32.partialorder %v529_v57, 8.507059e+37 }
 0x54b   :  { %v1078_v17 = vpop.eup %1077 }
 0x54c   :  { %v1080_v18 = vpop.eup %1079  ;;  %v506_v19 = vmul.f32 %v1078_v17, %v503_v15  ;;  %vm511_vm13 = vweird.f32 %v1078_v17 }
 0x54d   :  { %v521_v20 = vmul.f32 %v1080_v18, %v504_v16  ;;  %vm526_vm12 = vweird.f32 %v1080_v18  ;;  %vm512_vm3 = vmor %vm510_vm1, %vm511_vm13 }
 0x54e   :  { %v507_v52 = vsub.f32 1.0, %v506_v19  ;;  %vm527_vm15 = vmor %vm525_vm14, %vm526_vm12 }
 0x54f   :  { %v522_v53 = vsub.f32 1.0, %v521_v20 }
 0x550   :  { %v508_v54 = vmul.f32 %v1078_v17, %v507_v52 }
 0x551   :  { %v523_v56 = vmul.f32 %v1080_v18, %v522_v53 }
 0x552   :  { %v509_v58 = vadd.f32 %v1078_v17, %v508_v54 }
 0x553   :  { %v524_v59 = vadd.f32 %v1080_v18, %v523_v56 }
 0x554   :  { %v513_v10 = vsel %vm512_vm3, %v1078_v17, %v509_v58 }
 0x555   :  { %v528_v63 = vsel %vm527_vm15, %v1080_v18, %v524_v59  ;;  %v518_v21 = vsel %vm515_vm4, %v517_v13, %v513_v10 }
 0x556   :  { %v533_v9 = vsel %vm530_vm2, %v532_v61, %v528_v63  ;;  %v537_v26 = vmul.f32 %v518_v21, %v1375_v47 }
 0x557   :  { %v535_v12 = vmul.f32 2.0, %v533_v9 }
 0x559   :  { %v1015_v14 = vadd.f32 -1.0, %v535_v12 }
 0x55b   :  { %v538_v22 = vmul.f32 %v1015_v14, %v518_v21 }
 0x55d   :  { %540 = vrot.lane.b32.xlu0 %v538_v22, %s1179_s17 }
 0x5cf   :  { %v541_v27 = vpop.permute.xlu0 %540 }
 0x5d0   :  { %v1419_v28 = vadd.f32 %v541_v27, %v537_v26 }
 0x5d2   :  { %1081 = vtanh.f32 %v1419_v28 }
 0x5d8   :  { %v1082_v30 = vpop.eup %1081 }
 0x5d9   :  { %v545_v31 = vmul.f32 %v1082_v30, %v533_v9 }
 0x5db   :  { %547 = vrot.lane.b32.xlu1 %v545_v31, %s1179_s17 }
 0x64d   :  { %v548_v32 = vpop.permute.xlu1 %547 }
 0x64e   :  { %1016 = vmatmul.msk.f32.vlgmr.msrb.gmra.mxu0 %vm163_vm9, %v548_v32  ;;  %1017 = vmatmul.msk.f32.vlgmr.msrb.gmra.mxu1 %vm163_vm9, %v548_v32 }
 0x6cb   :  { %v568_v41 = vpop.f32.mrf.mxu0  ;;  %v588_v42 = vpop.f32.mrf.mxu1 }
 0x6cc   :  { %v591_v43 = vadd.f32 %v568_v41, %v110_v33  ;;  %v592_v44 = vadd.f32 %v588_v42, %v151_v34 }
 0x6ce   :  { %v1018_v45 = vmul.f32 -1.442695, %v591_v43  ;;  %v1019_v46 = vmul.f32 -1.442695, %v592_v44 }
 0x6d0   :  { %1083 = vpow2.f32 %v1018_v45 }
 0x6d1   :  { %1085 = vpow2.f32 %v1019_v46 }
 0x6d6   :  { %v1084_v47 = vpop.eup %1083 }
 0x6d7   :  { %v1086_v48 = vpop.eup %1085  ;;  %v599_v49 = vadd.f32 1.0, %v1084_v47 }
 0x6d8   :  { %v600_v50 = vadd.f32 1.0, %v1086_v48 }
 0x6d9   :  { %1087 = vrcp.f32 %v599_v49  ;;  %v612_v16 = vand.u32 2147483648, %v599_v49  ;;  %vm606_vm8 = vweird.f32 %v599_v49  ;;  %v610_v18 = vand.u32 2147483647, %v599_v49 }
 0x6da   :  { %1089 = vrcp.f32 %v600_v50  ;;  %v627_v6 = vand.u32 2147483648, %v600_v50  ;;  %v625_v8 = vand.u32 2147483647, %v600_v50  ;;  %vm621_vm6 = vweird.f32 %v600_v50 }
 0x6db   :  { %v613_v54 = vor.u32 1.1754944e-38, %v612_v16  ;;  %vm611_vm12 = vcmp.eq.f32.partialorder %v610_v18, 8.507059e+37 }
 0x6dc   :  { %v628_v17 = vor.u32 1.1754944e-38, %v627_v6  ;;  %vm626_vm10 = vcmp.eq.f32.partialorder %v625_v8, 8.507059e+37 }
 0x6df   :  { %v1088_v51 = vpop.eup %1087 }
 0x6e0   :  { %v1090_v0 = vpop.eup %1089  ;;  %v602_v1 = vmul.f32 %v1088_v51, %v599_v49  ;;  %vm607_vm5 = vweird.f32 %v1088_v51 }
 0x6e1   :  { %v617_v2 = vmul.f32 %v1090_v0, %v600_v50  ;;  %vm622_vm0 = vweird.f32 %v1090_v0  ;;  %vm608_vm11 = vmor %vm606_vm8, %vm607_vm5 }
 0x6e2   :  { %v603_v3 = vsub.f32 1.0, %v602_v1  ;;  %vm623_vm7 = vmor %vm621_vm6, %vm622_vm0 }
 0x6e3   :  { %v618_v4 = vsub.f32 1.0, %v617_v2 }
 0x6e4   :  { %v604_v5 = vmul.f32 %v1088_v51, %v603_v3 }
 0x6e5   :  { %v619_v7 = vmul.f32 %v1090_v0, %v618_v4 }
 0x6e6   :  { %v605_v11 = vadd.f32 %v1088_v51, %v604_v5 }
 0x6e7   :  { %v620_v15 = vadd.f32 %v1090_v0, %v619_v7 }
 0x6e8   :  { %v609_v52 = vsel %vm608_vm11, %v1088_v51, %v605_v11 }
 0x6e9   :  { %v624_v19 = vsel %vm623_vm7, %v1090_v0, %v620_v15  ;;  %v614_v56 = vsel %vm611_vm12, %v613_v54, %v609_v52 }
 0x6ea   :  { %v629_v20 = vsel %vm626_vm10, %v628_v17, %v624_v19  ;;  %v633_v58 = vmul.f32 %v614_v56, %v1419_v28 }
 0x6eb   :  { %v631_v53 = vmul.f32 2.0, %v629_v20 }
 0x6ed   :  { %v1020_v55 = vadd.f32 -1.0, %v631_v53 }
 0x6ef   :  { %v634_v57 = vmul.f32 %v1020_v55, %v614_v56 }
 0x6f1   :  { %636 = vrot.lane.b32.xlu2 %v634_v57, %s1179_s17 }
 0x74b   :  { %v637_v59 = vpop.permute.xlu2 %636 }
 0x74c   :  { %v639_v60 = vadd.f32 %v637_v59, %v633_v58 }
 0x74e   :  { %1091 = vtanh.f32 %v639_v60 }
 0x754   :  { %v1092_v61 = vpop.eup %1091 }
 0x755   :  { %v641_v62 = vmul.f32 %v1092_v61, %v629_v20 }
 0x757   :  { %643 = vrot.lane.b32.xlu0 %v641_v62, %s1179_s17 }
 0x7c9   :  { %v644_v63 = vpop.permute.xlu0 %643 }
 0x7ca   :  { %1021 = vmatmul.msk.f32.vlgmr.msra.gmra.mxu2 %vm163_vm9, %v644_v63  ;;  %1022 = vmatmul.msk.f32.vlgmr.msra.gmra.mxu3 %vm163_vm9, %v644_v63 }
 0x84d   :  { %v664_v9 = vpop.f32.mrf.mxu2  ;;  %v684_v10 = vpop.f32.mrf.mxu3 }
 0x84e   :  { %v687_v12 = vadd.f32 %v664_v9, %v1430_v35  ;;  %v688_v13 = vadd.f32 %v684_v10, %v1432_v36 }
 0x850   :  { %v1023_v14 = vmul.f32 -1.442695, %v687_v12  ;;  %v1024_v21 = vmul.f32 -1.442695, %v688_v13 }
 0x852   :  { %1093 = vpow2.f32 %v1023_v14 }
 0x853   :  { %1095 = vpow2.f32 %v1024_v21 }
 0x858   :  { %v1094_v22 = vpop.eup %1093 }
 0x859   :  { %v1096_v23 = vpop.eup %1095  ;;  %v695_v24 = vadd.f32 1.0, %v1094_v22 }
 0x85a   :  { %v696_v25 = vadd.f32 1.0, %v1096_v23 }
 0x85b   :  { %1097 = vrcp.f32 %v695_v24  ;;  %v708_v42 = vand.u32 2147483648, %v695_v24  ;;  %vm702_vm2 = vweird.f32 %v695_v24  ;;  %v706_v44 = vand.u32 2147483647, %v695_v24 }
 0x85c   :  { %1099 = vrcp.f32 %v696_v25  ;;  %v723_v33 = vand.u32 2147483648, %v696_v25  ;;  %v721_v35 = vand.u32 2147483647, %v696_v25  ;;  %vm717_vm15 = vweird.f32 %v696_v25 }
 0x85d   :  { %v709_v49 = vor.u32 1.1754944e-38, %v708_v42  ;;  %vm707_vm0 = vcmp.eq.f32.partialorder %v706_v44, 8.507059e+37 }
 0x85e   :  { %v724_v43 = vor.u32 1.1754944e-38, %v723_v33  ;;  %vm722_vm3 = vcmp.eq.f32.partialorder %v721_v35, 8.507059e+37 }
 0x861   :  { %v1098_v26 = vpop.eup %1097 }
 0x862   :  { %v1100_v27 = vpop.eup %1099  ;;  %v698_v28 = vmul.f32 %v1098_v26, %v695_v24  ;;  %vm703_vm14 = vweird.f32 %v1098_v26 }
 0x863   :  { %v713_v29 = vmul.f32 %v1100_v27, %v696_v25  ;;  %vm718_vm13 = vweird.f32 %v1100_v27  ;;  %vm704_vm4 = vmor %vm702_vm2, %vm703_vm14 }
 0x864   :  { %v699_v30 = vsub.f32 1.0, %v698_v28  ;;  %vm719_vm1 = vmor %vm717_vm15, %vm718_vm13 }
 0x865   :  { %v714_v31 = vsub.f32 1.0, %v713_v29 }
 0x866   :  { %v700_v32 = vmul.f32 %v1098_v26, %v699_v30 }
 0x867   :  { %v715_v34 = vmul.f32 %v1100_v27, %v714_v31 }
 0x868   :  { %v701_v36 = vadd.f32 %v1098_v26, %v700_v32 }
 0x869   :  { %v716_v41 = vadd.f32 %v1100_v27, %v715_v34 }
 0x86a   :  { %v705_v47 = vsel %vm704_vm4, %v1098_v26, %v701_v36 }
 0x86b   :  { %v720_v45 = vsel %vm719_vm1, %v1100_v27, %v716_v41  ;;  %v710_v51 = vsel %vm707_vm0, %v709_v49, %v705_v47 }
 0x86c   :  { %v725_v46 = vsel %vm722_vm3, %v724_v43, %v720_v45  ;;  %v729_v1 = vmul.f32 %v710_v51, %v639_v60 }
 0x86d   :  { %v727_v48 = vmul.f32 2.0, %v725_v46 }
 0x86f   :  { %v1025_v50 = vadd.f32 -1.0, %v727_v48 }
 0x871   :  { %v730_v0 = vmul.f32 %v1025_v50, %v710_v51 }
 0x873   :  { %732 = vrot.lane.b32.xlu1 %v730_v0, %s1179_s17 }
 0x8e5   :  { %v733_v2 = vpop.permute.xlu1 %732 }
 0x8e6   :  { %v735_v3 = vadd.f32 %v733_v2, %v729_v1 }
 0x8e8   :  { %1101 = vtanh.f32 %v735_v3 }
 0x8ee   :  { %v1102_v4 = vpop.eup %1101 }
 0x8ef   :  { %v737_v5 = vmul.f32 %v1102_v4, %v725_v46 }
 0x8f1   :  { %739 = vrot.lane.b32.xlu2 %v737_v5, %s1179_s17 }
 0x94b   :  { %v740_v6 = vpop.permute.xlu2 %739 }
 0x94c   :  { %1026 = vmatmul.msk.f32.vlgmr.msra.gmra.mxu0 %vm163_vm9, %v740_v6  ;;  %1027 = vmatmul.msk.f32.vlgmr.msra.gmra.mxu1 %vm163_vm9, %v740_v6 }
 0x9c9   :  { %v760_v7 = vpop.f32.mrf.mxu0  ;;  %v780_v8 = vpop.f32.mrf.mxu1 }
 0x9ca   :  { %v783_v11 = vadd.f32 %v760_v7, %v1434_v37  ;;  %v784_v15 = vadd.f32 %v780_v8, %v1436_v38 }
 0x9cc   :  { %v1028_v16 = vmul.f32 -1.442695, %v783_v11  ;;  %v1029_v17 = vmul.f32 -1.442695, %v784_v15 }
 0x9ce   :  { %1103 = vpow2.f32 %v1028_v16 }
 0x9cf   :  { %1105 = vpow2.f32 %v1029_v17 }
 0x9d4   :  { %v1104_v18 = vpop.eup %1103 }
 0x9d5   :  { %v1106_v19 = vpop.eup %1105  ;;  %v791_v20 = vadd.f32 1.0, %v1104_v18 }
 0x9d6   :  { %v792_v52 = vadd.f32 1.0, %v1106_v19 }
 0x9d7   :  { %1107 = vrcp.f32 %v791_v20  ;;  %v804_v63 = vand.u32 2147483648, %v791_v20  ;;  %vm798_vm10 = vweird.f32 %v791_v20  ;;  %v802_v10 = vand.u32 2147483647, %v791_v20 }
 0x9d8   :  { %1109 = vrcp.f32 %v792_v52  ;;  %v819_v37 = vand.u32 2147483648, %v792_v52  ;;  %v817_v38 = vand.u32 2147483647, %v792_v52  ;;  %vm813_vm7 = vweird.f32 %v792_v52 }
 0x9d9   :  { %v805_v22 = vor.u32 1.1754944e-38, %v804_v63  ;;  %vm803_vm13 = vcmp.eq.f32.partialorder %v802_v10, 8.507059e+37  ;;  %v938_v63 = vld [vmem:[#allocation2 + $0x120] sm:$0xff] }
 0x9da   :  { %v820_v9 = vor.u32 1.1754944e-38, %v819_v37  ;;  %vm818_vm11 = vcmp.eq.f32.partialorder %v817_v38, 8.507059e+37 }
 0x9dd   :  { %v1108_v53 = vpop.eup %1107 }
 0x9de   :  { %v1110_v54 = vpop.eup %1109  ;;  %v794_v55 = vmul.f32 %v1108_v53, %v791_v20  ;;  %vm799_vm6 = vweird.f32 %v1108_v53  ;;  %v937_v20 = vld [vmem:[#allocation2 + $0x110] sm:$0xff] }
 0x9df   :  { %v809_v56 = vmul.f32 %v1110_v54, %v792_v52  ;;  %vm814_vm5 = vweird.f32 %v1110_v54  ;;  %vm800_vm12 = vmor %vm798_vm10, %vm799_vm6  ;;  %v936_v52 = vld [vmem:[#allocation2 + $0x100] sm:$0xff]  ;;  %952 = vmatpush.msrb.mxu0 %v937_v20 }
 0x9e0   :  { %v795_v57 = vsub.f32 1.0, %v794_v55  ;;  %vm815_vm8 = vmor %vm813_vm7, %vm814_vm5  ;;  %v933_v55 = vld [vmem:[#allocation2 + $0xd0] sm:$0xff] }
 0x9e1   :  { %v810_v58 = vsub.f32 1.0, %v809_v56  ;;  %953 = vmatpush.msrb.mxu0 %v936_v52  ;;  %v932_v56 = vld [vmem:[#allocation2 + $0xc0] sm:$0xff] }
 0x9e2   :  { %v796_v59 = vmul.f32 %v1108_v53, %v795_v57  ;;  %v931_v57 = vld [vmem:[#allocation2 + $0xb0] sm:$0xff] }
 0x9e3   :  { %v811_v60 = vmul.f32 %v1110_v54, %v810_v58  ;;  %v930_v58 = vld [vmem:[#allocation2 + $0xa0] sm:$0xff] }
 0x9e4   :  { %v797_v61 = vadd.f32 %v1108_v53, %v796_v59 }
 0x9e5   :  { %v812_v62 = vadd.f32 %v1110_v54, %v811_v60 }
 0x9e6   :  { %v801_v14 = vsel %vm800_vm12, %v1108_v53, %v797_v61  ;;  %v935_v53 = vld [vmem:[#allocation2 + $0xf0] sm:$0xff] }
 0x9e7   :  { %v816_v12 = vsel %vm815_vm8, %v1110_v54, %v812_v62  ;;  %v806_v24 = vsel %vm803_vm13, %v805_v22, %v801_v14  ;;  %v934_v54 = vld [vmem:[#allocation2 + $0xe0] sm:$0xff]  ;;  %954 = vmatpush.msrb.mxu0 %v935_v53 }
 0x9e8   :  { %v821_v13 = vsel %vm818_vm11, %v820_v9, %v816_v12  ;;  %v825_v26 = vmul.f32 %v806_v24, %v735_v3 }
 0x9e9   :  { %v823_v21 = vmul.f32 2.0, %v821_v13  ;;  %955 = vmatpush.msrb.mxu0 %v934_v54 }
 0x9eb   :  { %v1030_v23 = vadd.f32 -1.0, %v823_v21  ;;  %956 = vmatpush.msrb.mxu0 %v933_v55 }
 0x9ed   :  { %v826_v25 = vmul.f32 %v1030_v23, %v806_v24  ;;  %957 = vmatpush.msrb.mxu0 %v932_v56 }
 0x9ef   :  { %828 = vrot.lane.b32.xlu0 %v826_v25, %s1179_s17  ;;  %958 = vmatpush.msrb.mxu0 %v931_v57 }
 0x9f1   :  { %959 = vmatpush.msrb.mxu0 %v930_v58 }
 0xa61   :  { %v829_v27 = vpop.permute.xlu0 %828 }
 0xa62   :  { %v1456_v28 = vadd.f32 %v829_v27, %v825_v26 }
 0xa64   :  { %1111 = vtanh.f32 %v1456_v28 }
 0xa6a   :  { %v1112_v29 = vpop.eup %1111 }
 0xa6b   :  { %v833_v30 = vmul.f32 %v1112_v29, %v821_v13 }
 0xa6d   :  { %835 = vrot.lane.b32.xlu1 %v833_v30, %s1179_s17 }
 0xadf   :  { %v836_v31 = vpop.permute.xlu1 %835 }
 0xae0   :  { %1031 = vmatmul.msk.f32.vlgmr.msrb.gmra.mxu2 %vm163_vm9, %v836_v31  ;;  %1032 = vmatmul.msk.f32.vlgmr.msrb.gmra.mxu3 %vm163_vm9, %v836_v31 }
 0xb63   :  { %v856_v32 = vpop.f32.mrf.mxu2  ;;  %v876_v33 = vpop.f32.mrf.mxu3 }
 0xb64   :  { %v879_v34 = vadd.f32 %v856_v32, %v1438_v39  ;;  %v880_v35 = vadd.f32 %v876_v33, %v1440_v40 }
 0xb66   :  { %v1033_v36 = vmul.f32 -1.442695, %v879_v34  ;;  %v1034_v41 = vmul.f32 -1.442695, %v880_v35 }
 0xb68   :  { %1113 = vpow2.f32 %v1033_v36 }
 0xb69   :  { %1115 = vpow2.f32 %v1034_v41 }
 0xb6e   :  { %v1114_v42 = vpop.eup %1113 }
 0xb6f   :  { %v1116_v43 = vpop.eup %1115  ;;  %v887_v44 = vadd.f32 1.0, %v1114_v42 }
 0xb70   :  { %v888_v45 = vadd.f32 1.0, %v1116_v43 }
 0xb71   :  { %1117 = vrcp.f32 %v887_v44  ;;  %v900_v4 = vand.u32 2147483648, %v887_v44  ;;  %vm894_vm3 = vweird.f32 %v887_v44  ;;  %v898_v6 = vand.u32 2147483647, %v887_v44 }
 0xb72   :  { %1119 = vrcp.f32 %v888_v45  ;;  %v915_v39 = vand.u32 2147483648, %v888_v45  ;;  %v913_v40 = vand.u32 2147483647, %v888_v45  ;;  %vm909_vm1 = vweird.f32 %v888_v45 }
 0xb73   :  { %v901_v16 = vor.u32 1.1754944e-38, %v900_v4  ;;  %vm899_vm5 = vcmp.eq.f32.partialorder %v898_v6, 8.507059e+37 }
 0xb74   :  { %v916_v5 = vor.u32 1.1754944e-38, %v915_v39  ;;  %vm914_vm4 = vcmp.eq.f32.partialorder %v913_v40, 8.507059e+37 }
 0xb77   :  { %v1118_v46 = vpop.eup %1117 }
 0xb78   :  { %v1120_v47 = vpop.eup %1119  ;;  %v890_v48 = vmul.f32 %v1118_v46, %v887_v44  ;;  %vm895_vm15 = vweird.f32 %v1118_v46 }
 0xb79   :  { %v905_v49 = vmul.f32 %v1120_v47, %v888_v45  ;;  %vm910_vm14 = vweird.f32 %v1120_v47  ;;  %vm896_vm0 = vmor %vm894_vm3, %vm895_vm15 }
 0xb7a   :  { %v891_v50 = vsub.f32 1.0, %v890_v48  ;;  %vm911_vm2 = vmor %vm909_vm1, %vm910_vm14 }
 0xb7b   :  { %v906_v51 = vsub.f32 1.0, %v905_v49 }
 0xb7c   :  { %v892_v0 = vmul.f32 %v1118_v46, %v891_v50 }
 0xb7d   :  { %v907_v1 = vmul.f32 %v1120_v47, %v906_v51 }
 0xb7e   :  { %v893_v2 = vadd.f32 %v1118_v46, %v892_v0 }
 0xb7f   :  { %v908_v3 = vadd.f32 %v1120_v47, %v907_v1 }
 0xb80   :  { %v897_v11 = vsel %vm896_vm0, %v1118_v46, %v893_v2 }
 0xb81   :  { %v912_v7 = vsel %vm911_vm2, %v1120_v47, %v908_v3  ;;  %v902_v18 = vsel %vm899_vm5, %v901_v16, %v897_v11 }
 0xb82   :  { %v917_v8 = vsel %vm914_vm4, %v916_v5, %v912_v7  ;;  %v921_v59 = vmul.f32 %v902_v18, %v1456_v28 }
 0xb83   :  { %v919_v15 = vmul.f32 2.0, %v917_v8 }
 0xb85   :  { %v1035_v17 = vadd.f32 -1.0, %v919_v15 }
 0xb87   :  { %v922_v19 = vmul.f32 %v1035_v17, %v902_v18 }
 0xb89   :  { %924 = vrot.lane.b32.xlu2 %v922_v19, %s1179_s17 }
 0xbe3   :  { %v925_v37 = vpop.permute.xlu2 %924 }
 0xbe4   :  { %v927_v60 = vadd.f32 %v925_v37, %v921_v59 }
 0xbe6   :  { %1121 = vtanh.f32 %v927_v60 }
 0xbec   :  { %v1122_v38 = vpop.eup %1121 }
 0xbed   :  { %v929_v61 = vmul.f32 %v1122_v38, %v917_v8 }
 0xbef   :  { %940 = vrot.lane.b32.xlu0 %v929_v61, %s1179_s17 }
 0xc61   :  { %v941_v62 = vpop.permute.xlu0 %940 }
 0xc62   :  { %1036 = vmatmul.msk.f32.vlgmr.msrb.gmra.mxu0 %vm163_vm9, %v941_v62 }
 0xcdf   :  { %v961_v9 = vpop.f32.mrf.mxu0 }
 0xce0   :  { %v962_v10 = vadd.f32 %v961_v9, %v938_v63 }
 0xce2   :  { %964 = vst [vmem:[#allocation5] sm:$0xff] %v962_v10 }
 0xce3   :  { %975 = dma.vmem_to_hbm [thread:$0]  %s971_s4, 128, %s973_s7, [#allocation4]  }
 0xce4   :  { %1173 = dma.done.wait [#allocation4], 128  }
 0xce5   :  { %1174 = vsyncadd [#allocation4], 4294967168 }
 0xce6   :  { %980 = vsyncpa [#allocation3], 1 }
 0xce7   :  { %981 = vsyncpa [#allocation4], 1 }

</bundles_post_ra>
